<compile_context>
chip_gen: v7x
topology: tpu7x:2x2x1
jax: 0.10.0
libtpu: 0.0.40
codegen_flags: <defaults>
</compile_context>

<pallas_src>
import math

import jax
import jax.numpy as jnp
from jax.experimental import pallas as pl
from jax.experimental.pallas import tpu as pltpu


def _elu(v):
    # F.elu with alpha=1:  v if v > 0 else exp(v) - 1.
    # exp lowers to the EUP slot (free alongside VPU/MXU work); the minimum()
    # keeps the untaken branch from overflowing for large positive v.
    return jnp.where(v > 0, v, jnp.exp(jnp.minimum(v, 0.0)) - 1.0)


# ----------------------------------------------------------------------------
# Fused NodeNet kernel, per node-tile:
#   S^T[e, n]   = (src[e] == global node id n)              (VPU compare)
#   edge_sum^T  = edge_attr^T @ S^T                         (MXU, all channels at once)
#   h0          = elu(W0x @ x^T + W0e @ edge_sum^T + b0)    (split W0 avoids a concat)
#   h1          = elu(W2 @ h0 + b2)
#   out^T       = W3 @ h1 + b3                              (lane-dense full-width store)
# ----------------------------------------------------------------------------
def _nodenet_kernel(src_ref, ea_t_ref, x_t_ref,
                    w0x_ref, w0e_ref, b0_ref,
                    w2_ref, b2_ref, w3_ref, b3_ref,
                    out_ref):
    ntile = out_ref.shape[1]
    tile0 = pl.program_id(0) * ntile
    # global node ids covered by this tile, laid out along lanes: (1, ntile)
    node_ids = tile0 + jax.lax.broadcasted_iota(jnp.int32, (1, ntile), 1)

    # one-hot transposed scatter matrix (Epad, ntile); padded edges carry src = -1
    # so they never match a node (their edge_attr columns are zero anyway).
    s_t = (src_ref[...] == node_ids).astype(jnp.float32)

    # scatter-add of edge_attr rows onto their source nodes, all channels batched
    edge_sum_t = jnp.dot(ea_t_ref[...], s_t,
                         preferred_element_type=jnp.float32)        # (H, ntile)

    # 3-layer MLP in channels-by-nodes layout (node axis dense in lanes)
    h = (jnp.dot(w0x_ref[...], x_t_ref[...], preferred_element_type=jnp.float32)
         + jnp.dot(w0e_ref[...], edge_sum_t, preferred_element_type=jnp.float32)
         + b0_ref[...])                                              # (hid, ntile)
    h = _elu(h)
    h = _elu(jnp.dot(w2_ref[...], h, preferred_element_type=jnp.float32)
             + b2_ref[...])
    out_ref[...] = (jnp.dot(w3_ref[...], h, preferred_element_type=jnp.float32)
                    + b3_ref[...])                                   # (C_out, ntile)


def nodenet_forward(params, x, edge_index, edge_attr, *, node_tile=128):
    """NodeNet forward.  x:(N,Fx) f32, edge_index:(2,E) i32, edge_attr:(E,>=H) f32."""
    n, fx = x.shape
    e = edge_index.shape[1]
    hid = params['W2'].shape[0]
    hch = params['W0'].shape[1] - fx          # hidden_channels (# edge_sum columns)
    out_ch = params['W3'].shape[0]

    npad = pl.cdiv(n, node_tile) * node_tile
    epad = pl.cdiv(e, 128) * 128

    # transposed, lane-dense slabs; zero-pad features, -1-pad src so padded edges
    # never hit a real node
    x_t = jnp.zeros((fx, npad), jnp.float32).at[:, :n].set(x.T)
    ea_t = jnp.zeros((hch, epad), jnp.float32).at[:, :e].set(edge_attr[:, :hch].T)
    src = jnp.full((epad, 1), -1, jnp.int32).at[:e, 0].set(edge_index[0])

    w0x = params['W0'][:, :fx]                # acts on x
    w0e = params['W0'][:, fx:]                # acts on edge_sum
    b0 = params['b0'][:, None]
    b2 = params['b2'][:, None]
    b3 = params['b3'][:, None]

    const = lambda i: (0, 0)
    out_t = pl.pallas_call(
        _nodenet_kernel,
        out_shape=jax.ShapeDtypeStruct((out_ch, npad), jnp.float32),
        grid=(npad // node_tile,),
        in_specs=[
            pl.BlockSpec((epad, 1), const),                    # src (edge_index[0])
            pl.BlockSpec((hch, epad), const),                  # edge_attr^T
            pl.BlockSpec((fx, node_tile), lambda i: (0, i)),   # x^T node tile
            pl.BlockSpec((hid, fx), const),                    # W0 (x part)
            pl.BlockSpec((hid, hch), const),                   # W0 (edge_sum part)
            pl.BlockSpec((hid, 1), const),                     # b0
            pl.BlockSpec((hid, hid), const),                   # W2
            pl.BlockSpec((hid, 1), const),                     # b2
            pl.BlockSpec((out_ch, hid), const),                # W3
            pl.BlockSpec((out_ch, 1), const),                  # b3
        ],
        out_specs=pl.BlockSpec((out_ch, node_tile), lambda i: (0, i)),
        compiler_params=pltpu.CompilerParams(
            dimension_semantics=("parallel",)),                # megacore split on v7x
    )(src, ea_t, x_t, w0x, w0e, b0, params['W2'], b2, params['W3'], b3)

    return out_t[:, :n].T                                      # back to (N, C_out)


# ----------------------------------------------------------------------------
# pure-JAX reference (mirrors the PyTorch module) and parameter init
# ----------------------------------------------------------------------------
def nodenet_reference(params, x, edge_index, edge_attr):
    n = x.shape[0]
    hch = params['W0'].shape[1] - x.shape[1]
    src = edge_index[0]
    edge_sum = jnp.zeros((n, hch), jnp.float32).at[src].add(edge_attr[:, :hch])
    inputs = jnp.concatenate([x, edge_sum], axis=1)
    h = jax.nn.elu(inputs @ params['W0'].T + params['b0'])
    h = jax.nn.elu(h @ params['W2'].T + params['b2'])
    return h @ params['W3'].T + params['b3']


def _init_linear(key, in_f, out_f):
    kw, kb = jax.random.split(key)
    lim = 1.0 / math.sqrt(in_f)
    w = jax.random.uniform(kw, (out_f, in_f), jnp.float32, -lim, lim)
    b = jax.random.uniform(kb, (out_f,), jnp.float32, -lim, lim)
    return w, b


def init_nodenet(key, in_channels, hidden_channels, out_channels):
    k0, k2, k3 = jax.random.split(key, 3)
    w0, b0 = _init_linear(k0, in_channels, hidden_channels)      # MLP.lin_0
    w2, b2 = _init_linear(k2, hidden_channels, hidden_channels)  # MLP.lin_2
    w3, b3 = _init_linear(k3, hidden_channels, out_channels)     # MLP.lin_3
    return dict(W0=w0, b0=b0, W2=w2, b2=b2, W3=w3, b3=b3)


# ----------------------------------------------------------------------------
# demo / self-check
# ----------------------------------------------------------------------------
if __name__ == "__main__":
    # NodeNet(dim=3, in_channels=48, hidden_channels=32, out_channels=8):
    # x carries in_channels - hidden_channels = 16 features (the forward cats
    # edge_sum with hidden_channels columns onto x before the MLP).
    # Deliberately non-multiples of 128 to exercise the node/edge padding paths.
    N, E = 200, 500
    hidden_channels = 32
    x_features = 16
    in_channels = x_features + hidden_channels
    out_channels = 8

    key = jax.random.PRNGKey(0)
    kx, ke, ka, kp = jax.random.split(key, 4)
    x = jax.random.normal(kx, (N, x_features), jnp.float32)
    edge_index = jax.random.randint(ke, (2, E), 0, N, dtype=jnp.int32)
    edge_attr = jax.random.normal(ka, (E, hidden_channels), jnp.float32)
    params = init_nodenet(kp, in_channels, hidden_channels, out_channels)

    fwd = jax.jit(nodenet_forward)
    out = fwd(params, x, edge_index, edge_attr)
    jax.block_until_ready(out)

    with jax.default_matmul_precision("float32"):
        ref = nodenet_reference(params, x, edge_index, edge_attr)

    assert out.shape == (N, out_channels) and out.dtype == jnp.float32
    assert bool(jnp.all(jnp.isfinite(out)))
    max_err = float(jnp.max(jnp.abs(out - ref)))
    assert max_err < 1e-2, f"mismatch vs reference, max abs err = {max_err}"
    print("KERNEL_OK")
</pallas_src>

<mosaic_0001>
module attributes {stable_mosaic.version = 11 : i64} {
  func.func @_nodenet_kernel(%arg0: i32, %arg1: memref<512x1xi32, #tpu.memory_space<vmem>>, %arg2: memref<32x512xf32, #tpu.memory_space<vmem>>, %arg3: memref<16x128xf32, #tpu.memory_space<vmem>>, %arg4: memref<32x16xf32, #tpu.memory_space<vmem>>, %arg5: memref<32x32xf32, #tpu.memory_space<vmem>>, %arg6: memref<32x1xf32, #tpu.memory_space<vmem>>, %arg7: memref<32x32xf32, #tpu.memory_space<vmem>>, %arg8: memref<32x1xf32, #tpu.memory_space<vmem>>, %arg9: memref<8x32xf32, #tpu.memory_space<vmem>>, %arg10: memref<8x1xf32, #tpu.memory_space<vmem>>, %arg11: memref<8x128xf32, #tpu.memory_space<vmem>>) attributes {dimension_semantics = [#tpu.dimension_semantics<parallel>], iteration_bounds = array<i64: 2>, scalar_prefetch = 0 : i64, scratch_operands = 0 : i64, tpu.core_type = #tpu.core_type<tc>, window_params = [{pipeline_mode = #tpu.pipeline_mode<synchronous>, transform_indices = @transform_0, window_bounds = array<i64: 512, 1>}, {pipeline_mode = #tpu.pipeline_mode<synchronous>, transform_indices = @transform_1, window_bounds = array<i64: 32, 512>}, {transform_indices = @transform_2, window_bounds = array<i64: 16, 128>}, {pipeline_mode = #tpu.pipeline_mode<synchronous>, transform_indices = @transform_3, window_bounds = array<i64: 32, 16>}, {pipeline_mode = #tpu.pipeline_mode<synchronous>, transform_indices = @transform_4, window_bounds = array<i64: 32, 32>}, {pipeline_mode = #tpu.pipeline_mode<synchronous>, transform_indices = @transform_5, window_bounds = array<i64: 32, 1>}, {pipeline_mode = #tpu.pipeline_mode<synchronous>, transform_indices = @transform_6, window_bounds = array<i64: 32, 32>}, {pipeline_mode = #tpu.pipeline_mode<synchronous>, transform_indices = @transform_7, window_bounds = array<i64: 32, 1>}, {pipeline_mode = #tpu.pipeline_mode<synchronous>, transform_indices = @transform_8, window_bounds = array<i64: 8, 32>}, {pipeline_mode = #tpu.pipeline_mode<synchronous>, transform_indices = @transform_9, window_bounds = array<i64: 8, 1>}, {transform_indices = @transform_10, window_bounds = array<i64: 8, 128>}]} {
    %c128_i32 = arith.constant 128 : i32
    %0 = arith.muli %arg0, %c128_i32 : i32
    %1 = tpu.iota {dimensions = array<i32: 1>} : vector<1x128xi32>
    %2 = vector.broadcast %0 : i32 to vector<1x128xi32>
    %3 = arith.addi %2, %1 : vector<1x128xi32>
    %c0 = arith.constant 0 : index
    %c0_0 = arith.constant 0 : index
    %4 = vector.load %arg1[%c0, %c0_0] : memref<512x1xi32, #tpu.memory_space<vmem>>, vector<512x1xi32>
    %5 = vector.broadcast %4 : vector<512x1xi32> to vector<512x128xi32>
    %6 = vector.broadcast %3 : vector<1x128xi32> to vector<512x128xi32>
    %7 = arith.cmpi eq, %5, %6 : vector<512x128xi32>
    %8 = arith.extui %7 : vector<512x128xi1> to vector<512x128xi32>
    %9 = arith.sitofp %8 : vector<512x128xi32> to vector<512x128xf32>
    %c0_1 = arith.constant 0 : index
    %c0_2 = arith.constant 0 : index
    %10 = vector.load %arg2[%c0_1, %c0_2] : memref<32x512xf32, #tpu.memory_space<vmem>>, vector<32x512xf32>
    %cst = arith.constant dense<0.000000e+00> : vector<32x128xf32>
    %11 = tpu.matmul %10, %9, %cst {dimension_numbers = #tpu.dot_dimension_numbers<[1], [0], [0], [1], [0, 0, 1, 1], [], []>} : vector<32x512xf32>, vector<512x128xf32>, vector<32x128xf32> -> vector<32x128xf32>
    %c0_3 = arith.constant 0 : index
    %c0_4 = arith.constant 0 : index
    %12 = vector.load %arg4[%c0_3, %c0_4] : memref<32x16xf32, #tpu.memory_space<vmem>>, vector<32x16xf32>
    %c0_5 = arith.constant 0 : index
    %c0_6 = arith.constant 0 : index
    %13 = vector.load %arg3[%c0_5, %c0_6] : memref<16x128xf32, #tpu.memory_space<vmem>>, vector<16x128xf32>
    %cst_7 = arith.constant dense<0.000000e+00> : vector<32x128xf32>
    %14 = tpu.matmul %12, %13, %cst_7 {dimension_numbers = #tpu.dot_dimension_numbers<[1], [0], [0], [1], [0, 0, 1, 1], [], []>} : vector<32x16xf32>, vector<16x128xf32>, vector<32x128xf32> -> vector<32x128xf32>
    %c0_8 = arith.constant 0 : index
    %c0_9 = arith.constant 0 : index
    %15 = vector.load %arg5[%c0_8, %c0_9] : memref<32x32xf32, #tpu.memory_space<vmem>>, vector<32x32xf32>
    %cst_10 = arith.constant dense<0.000000e+00> : vector<32x128xf32>
    %16 = tpu.matmul %15, %11, %cst_10 {dimension_numbers = #tpu.dot_dimension_numbers<[1], [0], [0], [1], [0, 0, 1, 1], [], []>} : vector<32x32xf32>, vector<32x128xf32>, vector<32x128xf32> -> vector<32x128xf32>
    %17 = arith.addf %14, %16 : vector<32x128xf32>
    %c0_11 = arith.constant 0 : index
    %c0_12 = arith.constant 0 : index
    %18 = vector.load %arg6[%c0_11, %c0_12] : memref<32x1xf32, #tpu.memory_space<vmem>>, vector<32x1xf32>
    %19 = vector.broadcast %18 : vector<32x1xf32> to vector<32x128xf32>
    %20 = arith.addf %17, %19 : vector<32x128xf32>
    %cst_13 = arith.constant 0.000000e+00 : f32
    %21 = vector.broadcast %cst_13 : f32 to vector<32x128xf32>
    %22 = arith.cmpf ogt, %20, %21 : vector<32x128xf32>
    %cst_14 = arith.constant 0.000000e+00 : f32
    %23 = vector.broadcast %cst_14 : f32 to vector<32x128xf32>
    %24 = arith.minimumf %20, %23 : vector<32x128xf32>
    %25 = math.exp %24 : vector<32x128xf32>
    %cst_15 = arith.constant 1.000000e+00 : f32
    %26 = vector.broadcast %cst_15 : f32 to vector<32x128xf32>
    %27 = arith.subf %25, %26 : vector<32x128xf32>
    %28 = arith.select %22, %20, %27 : vector<32x128xi1>, vector<32x128xf32>
    %c0_16 = arith.constant 0 : index
    %c0_17 = arith.constant 0 : index
    %29 = vector.load %arg7[%c0_16, %c0_17] : memref<32x32xf32, #tpu.memory_space<vmem>>, vector<32x32xf32>
    %cst_18 = arith.constant dense<0.000000e+00> : vector<32x128xf32>
    %30 = tpu.matmul %29, %28, %cst_18 {dimension_numbers = #tpu.dot_dimension_numbers<[1], [0], [0], [1], [0, 0, 1, 1], [], []>} : vector<32x32xf32>, vector<32x128xf32>, vector<32x128xf32> -> vector<32x128xf32>
    %c0_19 = arith.constant 0 : index
    %c0_20 = arith.constant 0 : index
    %31 = vector.load %arg8[%c0_19, %c0_20] : memref<32x1xf32, #tpu.memory_space<vmem>>, vector<32x1xf32>
    %32 = vector.broadcast %31 : vector<32x1xf32> to vector<32x128xf32>
    %33 = arith.addf %30, %32 : vector<32x128xf32>
    %cst_21 = arith.constant 0.000000e+00 : f32
    %34 = vector.broadcast %cst_21 : f32 to vector<32x128xf32>
    %35 = arith.cmpf ogt, %33, %34 : vector<32x128xf32>
    %cst_22 = arith.constant 0.000000e+00 : f32
    %36 = vector.broadcast %cst_22 : f32 to vector<32x128xf32>
    %37 = arith.minimumf %33, %36 : vector<32x128xf32>
    %38 = math.exp %37 : vector<32x128xf32>
    %cst_23 = arith.constant 1.000000e+00 : f32
    %39 = vector.broadcast %cst_23 : f32 to vector<32x128xf32>
    %40 = arith.subf %38, %39 : vector<32x128xf32>
    %41 = arith.select %35, %33, %40 : vector<32x128xi1>, vector<32x128xf32>
    %c0_24 = arith.constant 0 : index
    %c0_25 = arith.constant 0 : index
    %42 = vector.load %arg9[%c0_24, %c0_25] : memref<8x32xf32, #tpu.memory_space<vmem>>, vector<8x32xf32>
    %cst_26 = arith.constant dense<0.000000e+00> : vector<8x128xf32>
    %43 = tpu.matmul %42, %41, %cst_26 {dimension_numbers = #tpu.dot_dimension_numbers<[1], [0], [0], [1], [0, 0, 1, 1], [], []>} : vector<8x32xf32>, vector<32x128xf32>, vector<8x128xf32> -> vector<8x128xf32>
    %c0_27 = arith.constant 0 : index
    %c0_28 = arith.constant 0 : index
    %44 = vector.load %arg10[%c0_27, %c0_28] : memref<8x1xf32, #tpu.memory_space<vmem>>, vector<8x1xf32>
    %45 = vector.broadcast %44 : vector<8x1xf32> to vector<8x128xf32>
    %46 = arith.addf %43, %45 : vector<8x128xf32>
    %c0_29 = arith.constant 0 : index
    %c0_30 = arith.constant 0 : index
    %47 = vector.load %arg11[%c0_29, %c0_30] : memref<8x128xf32, #tpu.memory_space<vmem>>, vector<8x128xf32>
    tpu.vector_store %arg11[%c0_29, %c0_30], %46 {strides = array<i32>} : memref<8x128xf32, #tpu.memory_space<vmem>>, vector<8x128xf32>,
    return
  }
  func.func @transform_0(%arg0: i32) -> (i32, i32) {
    %c0_i32 = arith.constant 0 : i32
    %c0_i32_0 = arith.constant 0 : i32
    %c0_i32_1 = arith.constant 0 : i32
    return %c0_i32, %c0_i32_0 : i32, i32
  }
  func.func @transform_1(%arg0: i32) -> (i32, i32) {
    %c0_i32 = arith.constant 0 : i32
    %c0_i32_0 = arith.constant 0 : i32
    %c0_i32_1 = arith.constant 0 : i32
    return %c0_i32, %c0_i32_0 : i32, i32
  }
  func.func @transform_2(%arg0: i32) -> (i32, i32) {
    %c0_i32 = arith.constant 0 : i32
    %c0_i32_0 = arith.constant 0 : i32
    return %c0_i32, %arg0 : i32, i32
  }
  func.func @transform_3(%arg0: i32) -> (i32, i32) {
    %c0_i32 = arith.constant 0 : i32
    %c0_i32_0 = arith.constant 0 : i32
    %c0_i32_1 = arith.constant 0 : i32
    return %c0_i32, %c0_i32_0 : i32, i32
  }
  func.func @transform_4(%arg0: i32) -> (i32, i32) {
    %c0_i32 = arith.constant 0 : i32
    %c0_i32_0 = arith.constant 0 : i32
    %c0_i32_1 = arith.constant 0 : i32
    return %c0_i32, %c0_i32_0 : i32, i32
  }
  func.func @transform_5(%arg0: i32) -> (i32, i32) {
    %c0_i32 = arith.constant 0 : i32
    %c0_i32_0 = arith.constant 0 : i32
    %c0_i32_1 = arith.constant 0 : i32
    return %c0_i32, %c0_i32_0 : i32, i32
  }
  func.func @transform_6(%arg0: i32) -> (i32, i32) {
    %c0_i32 = arith.constant 0 : i32
    %c0_i32_0 = arith.constant 0 : i32
    %c0_i32_1 = arith.constant 0 : i32
    return %c0_i32, %c0_i32_0 : i32, i32
  }
  func.func @transform_7(%arg0: i32) -> (i32, i32) {
    %c0_i32 = arith.constant 0 : i32
    %c0_i32_0 = arith.constant 0 : i32
    %c0_i32_1 = arith.constant 0 : i32
    return %c0_i32, %c0_i32_0 : i32, i32
  }
  func.func @transform_8(%arg0: i32) -> (i32, i32) {
    %c0_i32 = arith.constant 0 : i32
    %c0_i32_0 = arith.constant 0 : i32
    %c0_i32_1 = arith.constant 0 : i32
    return %c0_i32, %c0_i32_0 : i32, i32
  }
  func.func @transform_9(%arg0: i32) -> (i32, i32) {
    %c0_i32 = arith.constant 0 : i32
    %c0_i32_0 = arith.constant 0 : i32
    %c0_i32_1 = arith.constant 0 : i32
    return %c0_i32, %c0_i32_0 : i32, i32
  }
  func.func @transform_10(%arg0: i32) -> (i32, i32) {
    %c0_i32 = arith.constant 0 : i32
    %c0_i32_0 = arith.constant 0 : i32
    return %c0_i32, %arg0 : i32, i32
  }
}

</mosaic_0001>

<bundles_post_ra>
// kernel: nodenet_forward.1
= control target key start
LH: loop header
LB: loop body
LE: loop exit
PB: predicated region body
PF: predicated region fallthrough
CT: control target
= control target key end

     0   :  { %s2132_s13 = smov 0   ;;  %s2134_s14 = smov 0   ;;  %s2590_s0 = inlined_call_operand.vmem [shape: s32[512,1], index: 0, kind: input, shape index: {}]   ;;  %s2591_s1 = inlined_call_operand.vmem [shape: f32[32,512], index: 1, kind: input, shape index: {}]   ;;  %s2592_s2 = inlined_call_operand.vmem [shape: f32[16,256], index: 2, kind: input, shape index: {}]   ;;  %s2593_s3 = inlined_call_operand.vmem [shape: f32[32,16], index: 3, kind: input, shape index: {}]   ;;  %s2594_s4 = inlined_call_operand.vmem [shape: f32[32,32], index: 4, kind: input, shape index: {}]   ;;  %s2595_s5 = inlined_call_operand.vmem [shape: f32[32,1], index: 5, kind: input, shape index: {}]   ;;  %s2596_s6 = inlined_call_operand.vmem [shape: f32[32,32], index: 6, kind: input, shape index: {}]   ;;  %s2597_s7 = inlined_call_operand.vmem [shape: f32[32,1], index: 7, kind: input, shape index: {}]   ;;  %s2598_s8 = inlined_call_operand.vmem [shape: f32[8,32], index: 8, kind: input, shape index: {}]   ;;  %s2599_s9 = inlined_call_operand.vmem [shape: f32[8,1], index: 9, kind: input, shape index: {}]   ;;  %s2600_s10 = inlined_call_operand.vmem [shape: f32[8,256], index: 10, kind: output, shape index: {}]  }
   0x1   :  { %s2136_s15 = smov 0  }
   0x2 LB: > { %s2145_s16 = sadd.s32 4294967295, %s2070_s15   ;;  %s2147_s17 = sadd.s32 1, %s2070_s15   ;;  %s2070_s15 = sphi %s2136_s15, %s2603_s15   ;;  %s2066_s14 = sphi %s2134_s14, %s2602_s14   ;;  %s2062_s13 = sphi %s2132_s13, %s2601_s13  }
   0x3   : > { %s66_s18 = ssub.s32 %s2070_s15, %s2147_s17  ;;  %s69_s19 = sadd.s32 1, %s2066_s14 }
   0x4   : > { %p67_p0 = scmp.eq.s32.totalorder %s66_s18, 0  ;;  %p76_p1 = scmp.ne.s32.totalorder %s2066_s14, %s2062_s13 }
   0x5   : > { %p77_p2 = scmp.eq.s32.totalorder %s2070_s15, 0  ;;  %p1585_p4 = scmp.ge.s32.totalorder %s2070_s15, 2 }
   0x6   : > { %s2154_s20 = scalar_select %p67_p0, %s2066_s14, %s69_s19  }
   0x7   : > { %p78_p3 = por %p77_p2, %p76_p1  ;;  %302 = sbr.rel (%p1585_p4) target bundleno = 21 (0x15), region = 52 }
   0xe   : > { %305 = sbr.rel (!%p78_p3) target bundleno = 21 (0x15), region = 56  ;;  %s307_s21 = sand.u32 (%p78_p3), 1, %s2066_s14  }
   0xf   : > { %s1587_s22 = sshll.u32 (%p78_p3), %s2070_s15, 3  ;;  %s1586_s23 = sshll.u32 (%p78_p3), %s307_s21, 4 }
  0x10   : > { %s311_s26 = scalar_lea.vmem (%p78_p3), %s2592_s2, %s1587_s22  ;;  %s309_s27 = scalar_lea.vmem (%p78_p3), [#allocation2], %s1586_s23 }
  0x11   : > { %v341_v0 = vld [vmem:[%s311_s26] sm:$0xff] (%p78_p3)  ;;  %v343_v1 = vld [vmem:[%s311_s26 + $0x10] sm:$0xff] (%p78_p3) }
  0x12   : > { %342 = vst [vmem:[%s309_s27] sm:$0xff] (%p78_p3), %v341_v0  ;;  %344 = vst [vmem:[%s309_s27 + $0x8] sm:$0xff] (%p78_p3), %v343_v1 }
  0x15 PF: > { %p1588_p5 = scmp.ge.s32.totalorder %s2070_s15, 1  ;;  %p349_p6 = scmp.lt.s32.totalorder %s2070_s15, 3 }
  0x17   : > { %p350_p7 = pnand %p1588_p5, %p349_p6 }
  0x18   : > { %v449_v2 = vld [vmem:[%s2590_s0 + $0x180] sm:$0xff] (!%p350_p7)  ;;  %v2072_v4 = vmov (!%p350_p7), 0   ;;  %v450_v5 = vld [vmem:[%s2590_s0 + $0x188] sm:$0xff] (!%p350_p7)  ;;  %v420_v11 = vld [vmem:[%s2590_s0 + $0x98] sm:$0xff] (!%p350_p7)  ;;  %v397_v1 = vlaneseq (!%p350_p7)  ;;  %s1591_s21 = sshll.u32 (!%p350_p7), %s2145_s16, 7  ;;  %s356_s29 = sand.u32 (!%p350_p7), 1, %s2062_s13  }
  0x19   : > { %353 = sbr.rel (%p350_p7) target bundleno = 1226 (0x4ca), region = 94  ;;  %v417_v3 = vld [vmem:[%s2590_s0 + $0x80] sm:$0xff] (!%p350_p7)  ;;  %2031 = vset.pattern.permute.xlu1 (!%p350_p7), %v2072_v4  ;;  %2030 = vset.pattern.permute.xlu0 (!%p350_p7), %v2072_v4  ;;  %v418_v6 = vld [vmem:[%s2590_s0 + $0x88] sm:$0xff] (!%p350_p7)  ;;  %v419_v12 = vld [vmem:[%s2590_s0 + $0x90] sm:$0xff] (!%p350_p7)  ;;  %s1589_s30 = sshll.u32 (!%p350_p7), %s356_s29, 4 }
  0x1a   : > { %610 = vperm.xlu1 (!%p350_p7), %2031, %v449_v2   ;;  %514 = vperm.xlu0 (!%p350_p7), %2030, %v417_v3   ;;  %v402_v7 = vld [vmem:[%s2590_s0 + $0x8] sm:$0xff] (!%p350_p7)  ;;  %v401_v8 = vld [vmem:[%s2590_s0] sm:$0xff] (!%p350_p7)  ;;  %v452_v13 = vld [vmem:[%s2590_s0 + $0x198] sm:$0xff] (!%p350_p7)  ;;  %v398_v4 = vand.u32 (!%p350_p7), 127, %v397_v1  ;;  %s358_s11 = scalar_lea.vmem (!%p350_p7), [#allocation2], %s1589_s30  ;;  %p392_p8 = scmp.lt.s32.totalorder (!%p350_p7), %s2145_s16, 1 }
  0x1b   : > { %v434_v9 = vld [vmem:[%s2590_s0 + $0x108] sm:$0xff] (!%p350_p7)  ;;  %v433_v10 = vld [vmem:[%s2590_s0 + $0x100] sm:$0xff] (!%p350_p7)  ;;  %v451_v14 = vld [vmem:[%s2590_s0 + $0x190] sm:$0xff] (!%p350_p7) }
  0x1c   : > { %v404_v15 = vld [vmem:[%s2590_s0 + $0x18] sm:$0xff] (!%p350_p7)  ;;  %v403_v16 = vld [vmem:[%s2590_s0 + $0x10] sm:$0xff] (!%p350_p7)  ;;  %v422_v19 = vld [vmem:[%s2590_s0 + $0xa8] sm:$0xff] (!%p350_p7) }
  0x1d   : > { %v436_v17 = vld [vmem:[%s2590_s0 + $0x118] sm:$0xff] (!%p350_p7)  ;;  %v435_v18 = vld [vmem:[%s2590_s0 + $0x110] sm:$0xff] (!%p350_p7)  ;;  %v421_v20 = vld [vmem:[%s2590_s0 + $0xa0] sm:$0xff] (!%p350_p7) }
  0x1e   : > { %613 = vperm.xlu1 (!%p350_p7), %2031, %v450_v5   ;;  %517 = vperm.xlu0 (!%p350_p7), %2030, %v418_v6   ;;  %v454_v21 = vld [vmem:[%s2590_s0 + $0x1a8] sm:$0xff] (!%p350_p7)  ;;  %v453_v22 = vld [vmem:[%s2590_s0 + $0x1a0] sm:$0xff] (!%p350_p7)  ;;  %v424_v27 = vld [vmem:[%s2590_s0 + $0xb8] sm:$0xff] (!%p350_p7)  ;;  %v399_v5 = vstv (!%p350_p7), %s1591_s21 }
  0x1f   : > { %v406_v23 = vld [vmem:[%s2590_s0 + $0x28] sm:$0xff] (!%p350_p7)  ;;  %v405_v24 = vld [vmem:[%s2590_s0 + $0x20] sm:$0xff] (!%p350_p7)  ;;  %v423_v28 = vld [vmem:[%s2590_s0 + $0xb0] sm:$0xff] (!%p350_p7) }
  0x20   : > { %v438_v25 = vld [vmem:[%s2590_s0 + $0x128] sm:$0xff]  ;;  %v437_v26 = vld [vmem:[%s2590_s0 + $0x120] sm:$0xff]  ;;  %v456_v29 = vld [vmem:[%s2590_s0 + $0x1b8] sm:$0xff]  ;;  %s2605_s16 = smov (!%p392_p8, %s2145_s16), 1 }
  0x21   : > { %v455_v30 = vld [vmem:[%s2590_s0 + $0x1b0] sm:$0xff]  ;;  %v408_v31 = vld [vmem:[%s2590_s0 + $0x38] sm:$0xff]  ;;  %v426_v35 = vld [vmem:[%s2590_s0 + $0xc8] sm:$0xff]  ;;  %s1590_s24 = sshll.u32 %s2605_s16, 3 }
  0x22   : > { %469 = vperm.xlu1 %2031, %v402_v7   ;;  %466 = vperm.xlu0 %2030, %v401_v8   ;;  %v407_v32 = vld [vmem:[%s2590_s0 + $0x30] sm:$0xff]  ;;  %v440_v33 = vld [vmem:[%s2590_s0 + $0x138] sm:$0xff]  ;;  %v425_v36 = vld [vmem:[%s2590_s0 + $0xc0] sm:$0xff]  ;;  %s395_s27 = scalar_lea.vmem %s2600_s10, %s1590_s24 }
  0x23   : > { %v439_v34 = vld [vmem:[%s2590_s0 + $0x130] sm:$0xff]  ;;  %v458_v37 = vld [vmem:[%s2590_s0 + $0x1c8] sm:$0xff]  ;;  %v457_v38 = vld [vmem:[%s2590_s0 + $0x1c0] sm:$0xff] }
  0x24   : > { %v410_v39 = vld [vmem:[%s2590_s0 + $0x48] sm:$0xff]  ;;  %v409_v40 = vld [vmem:[%s2590_s0 + $0x40] sm:$0xff]  ;;  %v428_v43 = vld [vmem:[%s2590_s0 + $0xd8] sm:$0xff] }
  0x25   : > { %v442_v41 = vld [vmem:[%s2590_s0 + $0x148] sm:$0xff]  ;;  %v441_v42 = vld [vmem:[%s2590_s0 + $0x140] sm:$0xff]  ;;  %v427_v44 = vld [vmem:[%s2590_s0 + $0xd0] sm:$0xff] }
  0x26   : > { %565 = vperm.xlu1 %2031, %v434_v9   ;;  %562 = vperm.xlu0 %2030, %v433_v10   ;;  %v460_v45 = vld [vmem:[%s2590_s0 + $0x1d8] sm:$0xff]  ;;  %v459_v46 = vld [vmem:[%s2590_s0 + $0x1d0] sm:$0xff]  ;;  %v430_v51 = vld [vmem:[%s2590_s0 + $0xe8] sm:$0xff] }
  0x27   : > { %v412_v47 = vld [vmem:[%s2590_s0 + $0x58] sm:$0xff]  ;;  %v411_v48 = vld [vmem:[%s2590_s0 + $0x50] sm:$0xff]  ;;  %v429_v52 = vld [vmem:[%s2590_s0 + $0xe0] sm:$0xff] }
  0x28   : > { %v444_v49 = vld [vmem:[%s2590_s0 + $0x158] sm:$0xff]  ;;  %v443_v50 = vld [vmem:[%s2590_s0 + $0x150] sm:$0xff]  ;;  %v462_v53 = vld [vmem:[%s2590_s0 + $0x1e8] sm:$0xff] }
  0x29   : > { %v461_v54 = vld [vmem:[%s2590_s0 + $0x1e0] sm:$0xff]  ;;  %v414_v55 = vld [vmem:[%s2590_s0 + $0x68] sm:$0xff]  ;;  %v432_v59 = vld [vmem:[%s2590_s0 + $0xf8] sm:$0xff] }
  0x2a   : > { %523 = vperm.xlu1 %2031, %v420_v11   ;;  %520 = vperm.xlu0 %2030, %v419_v12   ;;  %v413_v56 = vld [vmem:[%s2590_s0 + $0x60] sm:$0xff]  ;;  %v446_v57 = vld [vmem:[%s2590_s0 + $0x168] sm:$0xff]  ;;  %v431_v60 = vld [vmem:[%s2590_s0 + $0xf0] sm:$0xff]  ;;  %v2365_v12 = vadd.s32 %v399_v5, %v398_v4 }
  0x2b   : > { %v445_v58 = vld [vmem:[%s2590_s0 + $0x160] sm:$0xff]  ;;  %v464_v61 = vld [vmem:[%s2590_s0 + $0x1f8] sm:$0xff]  ;;  %v463_v62 = vld [vmem:[%s2590_s0 + $0x1f0] sm:$0xff] }
  0x2c   : > { %v416_v63 = vld [vmem:[%s2590_s0 + $0x78] sm:$0xff]  ;;  %v415_v0 = vld [vmem:[%s2590_s0 + $0x70] sm:$0xff]  ;;  %v1242_v6 = vld [vmem:[%s2595_s5 + $0x8] sm:$0xff] }
  0x2d   : > { %v448_v2 = vld [vmem:[%s2590_s0 + $0x178] sm:$0xff]  ;;  %v447_v3 = vld [vmem:[%s2590_s0 + $0x170] sm:$0xff]  ;;  %v1241_v7 = vld [vmem:[%s2595_s5] sm:$0xff] }
  0x2e   : > { %619 = vperm.xlu1 %2031, %v452_v13   ;;  %616 = vperm.xlu0 %2030, %v451_v14   ;;  %v850_v8 = vld [vmem:[%s2591_s1 + $0x8] sm:$0xff]  ;;  %v852_v11 = vld [vmem:[%s2591_s1 + $0x18] sm:$0xff]  ;;  %v1243_v14 = vld [vmem:[%s2595_s5 + $0x10] sm:$0xff] }
  0x2f   : > { %929 = vmatprep.mubr.f32.mxu0 %v850_v8  ;;  %v1244_v13 = vld [vmem:[%s2595_s5 + $0x18] sm:$0xff]  ;;  %1014 = vmatprep.mubr.f32.mxu1 %v852_v11 }
  0x32   : > { %475 = vperm.xlu1 %2031, %v404_v15   ;;  %472 = vperm.xlu0 %2030, %v403_v16  }
  0x36   : > { %571 = vperm.xlu1 %2031, %v436_v17   ;;  %568 = vperm.xlu0 %2030, %v435_v18   ;;  %v1298_v17 = vld [vmem:[%s2597_s7 + $0x8] sm:$0xff]  ;;  %v1297_v18 = vld [vmem:[%s2597_s7] sm:$0xff] }
  0x3a   : > { %529 = vperm.xlu1 %2031, %v422_v19   ;;  %526 = vperm.xlu0 %2030, %v421_v20   ;;  %v2073_v19 = vmov 1.0|1.0  }
  0x3e   : > { %625 = vperm.xlu1 %2031, %v454_v21   ;;  %622 = vperm.xlu0 %2030, %v453_v22   ;;  %v1300_v22 = vld [vmem:[%s2597_s7 + $0x18] sm:$0xff] }
  0x42   : > { %481 = vperm.xlu1 %2031, %v406_v23   ;;  %478 = vperm.xlu0 %2030, %v405_v24   ;;  %v1299_v23 = vld [vmem:[%s2597_s7 + $0x10] sm:$0xff] }
  0x46   : > { %577 = vperm.xlu1 %2031, %v438_v25   ;;  %574 = vperm.xlu0 %2030, %v437_v26   ;;  %v1443_v26 = vld [vmem:[%s2599_s9] sm:$0xff] }
  0x4a   : > { %535 = vperm.xlu1 %2031, %v424_v27   ;;  %532 = vperm.xlu0 %2030, %v423_v28  }
  0x4e   : > { %631 = vperm.xlu1 %2031, %v456_v29   ;;  %628 = vperm.xlu0 %2030, %v455_v30  }
  0x52   : > { %487 = vperm.xlu1 %2031, %v408_v31   ;;  %484 = vperm.xlu0 %2030, %v407_v32  }
  0x56   : > { %583 = vperm.xlu1 %2031, %v440_v33   ;;  %580 = vperm.xlu0 %2030, %v439_v34  }
  0x5a   : > { %541 = vperm.xlu1 %2031, %v426_v35   ;;  %538 = vperm.xlu0 %2030, %v425_v36  }
  0x5e   : > { %637 = vperm.xlu1 %2031, %v458_v37   ;;  %634 = vperm.xlu0 %2030, %v457_v38  }
  0x62   : > { %493 = vperm.xlu1 %2031, %v410_v39   ;;  %490 = vperm.xlu0 %2030, %v409_v40  }
  0x66   : > { %589 = vperm.xlu1 %2031, %v442_v41   ;;  %586 = vperm.xlu0 %2030, %v441_v42  }
  0x6a   : > { %547 = vperm.xlu1 %2031, %v428_v43   ;;  %544 = vperm.xlu0 %2030, %v427_v44  }
  0x6e   : > { %643 = vperm.xlu1 %2031, %v460_v45   ;;  %640 = vperm.xlu0 %2030, %v459_v46  }
  0x72   : > { %499 = vperm.xlu1 %2031, %v412_v47   ;;  %496 = vperm.xlu0 %2030, %v411_v48  }
  0x76   : > { %595 = vperm.xlu1 %2031, %v444_v49   ;;  %592 = vperm.xlu0 %2030, %v443_v50  }
  0x7a   : > { %553 = vperm.xlu1 %2031, %v430_v51   ;;  %550 = vperm.xlu0 %2030, %v429_v52  }
  0x7e   : > { %649 = vperm.xlu1 %2031, %v462_v53   ;;  %646 = vperm.xlu0 %2030, %v461_v54  }
  0x82   : > { %505 = vperm.xlu1 %2031, %v414_v55   ;;  %502 = vperm.xlu0 %2030, %v413_v56  }
  0x86   : > { %601 = vperm.xlu1 %2031, %v446_v57   ;;  %598 = vperm.xlu0 %2030, %v445_v58  }
  0x8a   : > { %559 = vperm.xlu1 %2031, %v432_v59   ;;  %556 = vperm.xlu0 %2030, %v431_v60  }
  0x8e   : > { %655 = vperm.xlu1 %2031, %v464_v61   ;;  %652 = vperm.xlu0 %2030, %v463_v62  }
  0x92   : > { %511 = vperm.xlu1 %2031, %v416_v63   ;;  %508 = vperm.xlu0 %2030, %v415_v0  }
  0x96   : > { %607 = vperm.xlu1 %2031, %v448_v2   ;;  %604 = vperm.xlu0 %2030, %v447_v3  }
  0x99   : > { %v611_v9 = vpop.permute.xlu1 %610  ;;  %v515_v10 = vpop.permute.xlu0 %514 }
  0x9a   : > { %1252 = vperm.xlu1 %2031, %v1242_v6   ;;  %1247 = vperm.xlu0 %2030, %v1241_v7   ;;  %vm673_vm0 = vcmp.eq.s32.totalorder %v515_v10, %v2365_v12  ;;  %vm705_vm3 = vcmp.eq.s32.totalorder %v611_v9, %v2365_v12 }
  0x9d   : > { %v614_v15 = vpop.permute.xlu1 %613  ;;  %v518_v16 = vpop.permute.xlu0 %517 }
  0x9e   : > { %vm706_vm1 = vcmp.eq.s32.totalorder %v614_v15, %v2365_v12  ;;  %vm674_vm2 = vcmp.eq.s32.totalorder %v518_v16, %v2365_v12  ;;  %1262 = vperm.xlu1 %2031, %v1244_v13   ;;  %1257 = vperm.xlu0 %2030, %v1243_v14  }
  0x9f   : > { %vm1907_vm4 = vmpackc.low %vm674_vm2, %vm673_vm0 }
  0xa0   : > { %1908 = vmatprep.subr.msk.bf16.mxu0 %vm1907_vm4, %v2073_v19  ;;  %vm1939_vm5 = vmpackc.low %vm706_vm1, %vm705_vm3 }
  0xa1   : > { %1940 = vmatprep.subr.msk.bf16.mxu1 %vm1939_vm5, %v2073_v19  ;;  %v470_v20 = vpop.permute.xlu1 %469  ;;  %v467_v21 = vpop.permute.xlu0 %466 }
  0xa2   : > { %vm658_vm6 = vcmp.eq.s32.totalorder %v470_v20, %v2365_v12  ;;  %vm657_vm7 = vcmp.eq.s32.totalorder %v467_v21, %v2365_v12  ;;  %1308 = vperm.xlu1 %2031, %v1298_v17   ;;  %1303 = vperm.xlu0 %2030, %v1297_v18   ;;  %v849_v18 = vld [vmem:[%s2591_s1] sm:$0xff] }
  0xa3   : > { %vm1909_vm8 = vmpackc.low %vm658_vm6, %vm657_vm7 }
  0xa4   : > { %1910 = vmatpush3.bf16.msk.msra.mxu0 %vm1909_vm8, %v2073_v19 }
  0xa5   : > { %v566_v24 = vpop.permute.xlu1 %565  ;;  %v563_v25 = vpop.permute.xlu0 %562 }
  0xa6   : > { %vm690_vm9 = vcmp.eq.s32.totalorder %v566_v24, %v2365_v12  ;;  %vm689_vm10 = vcmp.eq.s32.totalorder %v563_v25, %v2365_v12  ;;  %1318 = vperm.xlu1 %2031, %v1300_v22   ;;  %1313 = vperm.xlu0 %2030, %v1299_v23   ;;  %v854_v22 = vld [vmem:[%s2591_s1 + $0x28] sm:$0xff]  ;;  %v851_v23 = vld [vmem:[%s2591_s1 + $0x10] sm:$0xff]  ;;  %v853_v24 = vld [vmem:[%s2591_s1 + $0x20] sm:$0xff] }
  0xa7   : > { %vm1941_vm11 = vmpackc.low %vm690_vm9, %vm689_vm10  ;;  %v856_v25 = vld [vmem:[%s2591_s1 + $0x38] sm:$0xff] }
  0xa8   : > { %1942 = vmatpush3.bf16.msk.msra.mxu1 %vm1941_vm11, %v2073_v19 }
  0xa9   : > { %v524_v27 = vpop.permute.xlu1 %523  ;;  %v521_v28 = vpop.permute.xlu0 %520 }
  0xaa   : > { %vm676_vm12 = vcmp.eq.s32.totalorder %v524_v27, %v2365_v12  ;;  %vm675_vm13 = vcmp.eq.s32.totalorder %v521_v28, %v2365_v12  ;;  %1446 = vperm.xlu0 %2030, %v1443_v26   ;;  %v857_v26 = vld [vmem:[%s2591_s1 + $0x40] sm:$0xff]  ;;  %v860_v27 = vld [vmem:[%s2591_s1 + $0x58] sm:$0xff]  ;;  %v862_v28 = vld [vmem:[%s2591_s1 + $0x68] sm:$0xff] }
  0xab   : > { %vm1911_vm14 = vmpackc.low %vm676_vm12, %vm675_vm13 }
  0xac   : > { %1912 = vmatprep.subr.msk.bf16.mxu0 %vm1911_vm14, %v2073_v19 }
  0xad   : > { %v620_v29 = vpop.permute.xlu1 %619  ;;  %v617_v30 = vpop.permute.xlu0 %616 }
  0xae   : > { %vm708_vm15 = vcmp.eq.s32.totalorder %v620_v29, %v2365_v12  ;;  %vm707_vm0 = vcmp.eq.s32.totalorder %v617_v30, %v2365_v12  ;;  %v859_v29 = vld [vmem:[%s2591_s1 + $0x50] sm:$0xff]  ;;  %v861_v30 = vld [vmem:[%s2591_s1 + $0x60] sm:$0xff] }
  0xaf   : > { %vm1943_vm1 = vmpackc.low %vm708_vm15, %vm707_vm0 }
  0xb0   : > { %1944 = vmatprep.subr.msk.bf16.mxu1 %vm1943_vm1, %v2073_v19 }
  0xb1   : > { %v476_v31 = vpop.permute.xlu1 %475  ;;  %v473_v32 = vpop.permute.xlu0 %472 }
  0xb2   : > { %vm660_vm2 = vcmp.eq.s32.totalorder %v476_v31, %v2365_v12  ;;  %vm659_vm3 = vcmp.eq.s32.totalorder %v473_v32, %v2365_v12  ;;  %v864_v31 = vld [vmem:[%s2591_s1 + $0x78] sm:$0xff]  ;;  %v863_v32 = vld [vmem:[%s2591_s1 + $0x70] sm:$0xff] }
  0xb3   : > { %vm1913_vm4 = vmpackc.low %vm660_vm2, %vm659_vm3 }
  0xb4   : > { %1914 = vmatpush3.bf16.msk.msra.mxu0 %vm1913_vm4, %v2073_v19 }
  0xb5   : > { %v572_v33 = vpop.permute.xlu1 %571  ;;  %v569_v34 = vpop.permute.xlu0 %568 }
  0xb6   : > { %vm692_vm5 = vcmp.eq.s32.totalorder %v572_v33, %v2365_v12  ;;  %vm691_vm6 = vcmp.eq.s32.totalorder %v569_v34, %v2365_v12  ;;  %v1041_v33 = vld [vmem:[%s2594_s4] sm:$0xff] }
  0xb7   : > { %vm1945_vm7 = vmpackc.low %vm692_vm5, %vm691_vm6 }
  0xb8   : > { %1946 = vmatpush3.bf16.msk.msra.mxu1 %vm1945_vm7, %v2073_v19 }
  0xb9   : > { %v530_v35 = vpop.permute.xlu1 %529  ;;  %v527_v36 = vpop.permute.xlu0 %526 }
  0xba   : > { %vm678_vm8 = vcmp.eq.s32.totalorder %v530_v35, %v2365_v12  ;;  %vm677_vm9 = vcmp.eq.s32.totalorder %v527_v36, %v2365_v12 }
  0xbb   : > { %vm1915_vm10 = vmpackc.low %vm678_vm8, %vm677_vm9 }
  0xbc   : > { %1916 = vmatprep.subr.msk.bf16.mxu0 %vm1915_vm10, %v2073_v19 }
  0xbd   : > { %v626_v37 = vpop.permute.xlu1 %625  ;;  %v623_v38 = vpop.permute.xlu0 %622 }
  0xbe   : > { %vm710_vm11 = vcmp.eq.s32.totalorder %v626_v37, %v2365_v12  ;;  %vm709_vm12 = vcmp.eq.s32.totalorder %v623_v38, %v2365_v12 }
  0xbf   : > { %vm1947_vm13 = vmpackc.low %vm710_vm11, %vm709_vm12 }
  0xc0   : > { %1948 = vmatprep.subr.msk.bf16.mxu1 %vm1947_vm13, %v2073_v19 }
  0xc1   : > { %v482_v39 = vpop.permute.xlu1 %481  ;;  %v479_v40 = vpop.permute.xlu0 %478 }
  0xc2   : > { %vm662_vm14 = vcmp.eq.s32.totalorder %v482_v39, %v2365_v12  ;;  %vm661_vm15 = vcmp.eq.s32.totalorder %v479_v40, %v2365_v12 }
  0xc3   : > { %vm1917_vm0 = vmpackc.low %vm662_vm14, %vm661_vm15 }
  0xc4   : > { %1918 = vmatpush3.bf16.msk.msra.mxu0 %vm1917_vm0, %v2073_v19 }
  0xc5   : > { %v578_v41 = vpop.permute.xlu1 %577  ;;  %v575_v42 = vpop.permute.xlu0 %574 }
  0xc6   : > { %vm694_vm1 = vcmp.eq.s32.totalorder %v578_v41, %v2365_v12  ;;  %vm693_vm2 = vcmp.eq.s32.totalorder %v575_v42, %v2365_v12 }
  0xc7   : > { %vm1949_vm3 = vmpackc.low %vm694_vm1, %vm693_vm2 }
  0xc8   : > { %1950 = vmatpush3.bf16.msk.msra.mxu1 %vm1949_vm3, %v2073_v19 }
  0xc9   : > { %v536_v43 = vpop.permute.xlu1 %535  ;;  %v533_v44 = vpop.permute.xlu0 %532 }
  0xca   : > { %vm680_vm4 = vcmp.eq.s32.totalorder %v536_v43, %v2365_v12  ;;  %vm679_vm5 = vcmp.eq.s32.totalorder %v533_v44, %v2365_v12 }
  0xcb   : > { %vm1919_vm6 = vmpackc.low %vm680_vm4, %vm679_vm5 }
  0xcc   : > { %1920 = vmatprep.subr.msk.bf16.mxu0 %vm1919_vm6, %v2073_v19 }
  0xcd   : > { %v632_v45 = vpop.permute.xlu1 %631  ;;  %v629_v46 = vpop.permute.xlu0 %628 }
  0xce   : > { %vm712_vm7 = vcmp.eq.s32.totalorder %v632_v45, %v2365_v12  ;;  %vm711_vm8 = vcmp.eq.s32.totalorder %v629_v46, %v2365_v12 }
  0xcf   : > { %vm1951_vm9 = vmpackc.low %vm712_vm7, %vm711_vm8 }
  0xd0   : > { %1952 = vmatprep.subr.msk.bf16.mxu1 %vm1951_vm9, %v2073_v19 }
  0xd1   : > { %v488_v47 = vpop.permute.xlu1 %487  ;;  %v485_v48 = vpop.permute.xlu0 %484 }
  0xd2   : > { %vm664_vm10 = vcmp.eq.s32.totalorder %v488_v47, %v2365_v12  ;;  %vm663_vm11 = vcmp.eq.s32.totalorder %v485_v48, %v2365_v12 }
  0xd3   : > { %vm1921_vm12 = vmpackc.low %vm664_vm10, %vm663_vm11 }
  0xd4   : > { %1922 = vmatpush3.bf16.msk.msra.mxu0 %vm1921_vm12, %v2073_v19 }
  0xd5   : > { %v584_v49 = vpop.permute.xlu1 %583  ;;  %v581_v50 = vpop.permute.xlu0 %580 }
  0xd6   : > { %vm696_vm13 = vcmp.eq.s32.totalorder %v584_v49, %v2365_v12  ;;  %vm695_vm14 = vcmp.eq.s32.totalorder %v581_v50, %v2365_v12 }
  0xd7   : > { %vm1953_vm15 = vmpackc.low %vm696_vm13, %vm695_vm14 }
  0xd8   : > { %1954 = vmatpush3.bf16.msk.msra.mxu1 %vm1953_vm15, %v2073_v19 }
  0xd9   : > { %v542_v51 = vpop.permute.xlu1 %541  ;;  %v539_v52 = vpop.permute.xlu0 %538 }
  0xda   : > { %vm682_vm0 = vcmp.eq.s32.totalorder %v542_v51, %v2365_v12  ;;  %vm681_vm1 = vcmp.eq.s32.totalorder %v539_v52, %v2365_v12 }
  0xdb   : > { %vm1923_vm2 = vmpackc.low %vm682_vm0, %vm681_vm1 }
  0xdc   : > { %1924 = vmatprep.subr.msk.bf16.mxu0 %vm1923_vm2, %v2073_v19 }
  0xdd   : > { %v638_v53 = vpop.permute.xlu1 %637  ;;  %v635_v54 = vpop.permute.xlu0 %634 }
  0xde   : > { %vm714_vm3 = vcmp.eq.s32.totalorder %v638_v53, %v2365_v12  ;;  %vm713_vm4 = vcmp.eq.s32.totalorder %v635_v54, %v2365_v12 }
  0xdf   : > { %vm1955_vm5 = vmpackc.low %vm714_vm3, %vm713_vm4 }
  0xe0   : > { %1956 = vmatprep.subr.msk.bf16.mxu1 %vm1955_vm5, %v2073_v19 }
  0xe1   : > { %v494_v55 = vpop.permute.xlu1 %493  ;;  %v491_v56 = vpop.permute.xlu0 %490 }
  0xe2   : > { %vm666_vm6 = vcmp.eq.s32.totalorder %v494_v55, %v2365_v12  ;;  %vm665_vm7 = vcmp.eq.s32.totalorder %v491_v56, %v2365_v12 }
  0xe3   : > { %vm1925_vm8 = vmpackc.low %vm666_vm6, %vm665_vm7 }
  0xe4   : > { %1926 = vmatpush3.bf16.msk.msra.mxu0 %vm1925_vm8, %v2073_v19 }
  0xe5   : > { %v590_v57 = vpop.permute.xlu1 %589  ;;  %v587_v58 = vpop.permute.xlu0 %586 }
  0xe6   : > { %vm698_vm9 = vcmp.eq.s32.totalorder %v590_v57, %v2365_v12  ;;  %vm697_vm10 = vcmp.eq.s32.totalorder %v587_v58, %v2365_v12 }
  0xe7   : > { %vm1957_vm11 = vmpackc.low %vm698_vm9, %vm697_vm10 }
  0xe8   : > { %1958 = vmatpush3.bf16.msk.msra.mxu1 %vm1957_vm11, %v2073_v19 }
  0xe9   : > { %v548_v59 = vpop.permute.xlu1 %547  ;;  %v545_v60 = vpop.permute.xlu0 %544 }
  0xea   : > { %vm684_vm12 = vcmp.eq.s32.totalorder %v548_v59, %v2365_v12  ;;  %vm683_vm13 = vcmp.eq.s32.totalorder %v545_v60, %v2365_v12 }
  0xeb   : > { %vm1927_vm14 = vmpackc.low %vm684_vm12, %vm683_vm13 }
  0xec   : > { %1928 = vmatprep.subr.msk.bf16.mxu0 %vm1927_vm14, %v2073_v19 }
  0xed   : > { %v644_v61 = vpop.permute.xlu1 %643  ;;  %v641_v62 = vpop.permute.xlu0 %640 }
  0xee   : > { %vm716_vm15 = vcmp.eq.s32.totalorder %v644_v61, %v2365_v12  ;;  %vm715_vm0 = vcmp.eq.s32.totalorder %v641_v62, %v2365_v12  ;;  %v1039_v62 = vld [vmem:[%s358_s11] sm:$0xff] }
  0xef   : > { %vm1959_vm1 = vmpackc.low %vm716_vm15, %vm715_vm0 }
  0xf0   : > { %1960 = vmatprep.subr.msk.bf16.mxu1 %vm1959_vm1, %v2073_v19 }
  0xf1   : > { %v500_v63 = vpop.permute.xlu1 %499  ;;  %v497_v0 = vpop.permute.xlu0 %496 }
  0xf2   : > { %vm668_vm2 = vcmp.eq.s32.totalorder %v500_v63, %v2365_v12  ;;  %vm667_vm3 = vcmp.eq.s32.totalorder %v497_v0, %v2365_v12  ;;  %v1040_v63 = vld [vmem:[%s358_s11 + $0x8] sm:$0xff] }
  0xf3   : > { %vm1929_vm4 = vmpackc.low %vm668_vm2, %vm667_vm3 }
  0xf4   : > { %1930 = vmatpush3.bf16.msk.msra.mxu0 %vm1929_vm4, %v2073_v19 }
  0xf5   : > { %v596_v1 = vpop.permute.xlu1 %595  ;;  %v593_v2 = vpop.permute.xlu0 %592 }
  0xf6   : > { %vm700_vm5 = vcmp.eq.s32.totalorder %v596_v1, %v2365_v12  ;;  %vm699_vm6 = vcmp.eq.s32.totalorder %v593_v2, %v2365_v12  ;;  %v1979_v2 = vpack.c.bf16 %v1040_v63, %v1039_v62 }
  0xf7   : > { %vm1961_vm7 = vmpackc.low %vm700_vm5, %vm699_vm6 }
  0xf8   : > { %1962 = vmatpush3.bf16.msk.msra.mxu1 %vm1961_vm7, %v2073_v19 }
  0xf9   : > { %v554_v3 = vpop.permute.xlu1 %553  ;;  %v551_v4 = vpop.permute.xlu0 %550 }
  0xfa   : > { %vm686_vm8 = vcmp.eq.s32.totalorder %v554_v3, %v2365_v12  ;;  %vm685_vm9 = vcmp.eq.s32.totalorder %v551_v4, %v2365_v12  ;;  %v1042_v3 = vld [vmem:[%s2594_s4 + $0x8] sm:$0xff]  ;;  %v1043_v4 = vld [vmem:[%s2594_s4 + $0x10] sm:$0xff] }
  0xfb   : > { %vm1931_vm10 = vmpackc.low %vm686_vm8, %vm685_vm9 }
  0xfc   : > { %1932 = vmatprep.subr.msk.bf16.mxu0 %vm1931_vm10, %v2073_v19 }
  0xfd   : > { %v650_v5 = vpop.permute.xlu1 %649  ;;  %v647_v6 = vpop.permute.xlu0 %646 }
  0xfe   : > { %vm718_vm11 = vcmp.eq.s32.totalorder %v650_v5, %v2365_v12  ;;  %vm717_vm12 = vcmp.eq.s32.totalorder %v647_v6, %v2365_v12  ;;  %v1044_v5 = vld [vmem:[%s2594_s4 + $0x18] sm:$0xff]  ;;  %v1035_v6 = vld [vmem:[%s2593_s3] sm:$0xff] }
  0xff   : > { %vm1963_vm13 = vmpackc.low %vm718_vm11, %vm717_vm12 }
 0x100   : > { %1964 = vmatprep.subr.msk.bf16.mxu1 %vm1963_vm13, %v2073_v19 }
 0x101   : > { %v506_v7 = vpop.permute.xlu1 %505  ;;  %v503_v8 = vpop.permute.xlu0 %502 }
 0x102   : > { %vm670_vm14 = vcmp.eq.s32.totalorder %v506_v7, %v2365_v12  ;;  %vm669_vm15 = vcmp.eq.s32.totalorder %v503_v8, %v2365_v12  ;;  %v1036_v7 = vld [vmem:[%s2593_s3 + $0x8] sm:$0xff]  ;;  %v1037_v8 = vld [vmem:[%s2593_s3 + $0x10] sm:$0xff] }
 0x103   : > { %vm1933_vm0 = vmpackc.low %vm670_vm14, %vm669_vm15 }
 0x104   : > { %1934 = vmatpush3.bf16.msk.msra.mxu0 %vm1933_vm0, %v2073_v19  ;;  %vm1045_vm0 = vcmask 261120  }
 0x105   : > { %v602_v9 = vpop.permute.xlu1 %601  ;;  %v599_v10 = vpop.permute.xlu0 %598 }
 0x106   : > { %vm702_vm1 = vcmp.eq.s32.totalorder %v602_v9, %v2365_v12  ;;  %vm701_vm2 = vcmp.eq.s32.totalorder %v599_v10, %v2365_v12  ;;  %v1038_v9 = vld [vmem:[%s2593_s3 + $0x18] sm:$0xff]  ;;  %v1293_v10 = vld [vmem:[%s2596_s6] sm:$0xff] }
 0x107   : > { %vm1965_vm3 = vmpackc.low %vm702_vm1, %vm701_vm2  ;;  %vm1143_vm1 = vcmask 130048  }
 0x108   : > { %1966 = vmatpush3.bf16.msk.msra.mxu1 %vm1965_vm3, %v2073_v19 }
 0x109   : > { %v560_v11 = vpop.permute.xlu1 %559  ;;  %v557_v13 = vpop.permute.xlu0 %556 }
 0x10a   : > { %vm688_vm4 = vcmp.eq.s32.totalorder %v560_v11, %v2365_v12  ;;  %vm687_vm5 = vcmp.eq.s32.totalorder %v557_v13, %v2365_v12 }
 0x10b   : > { %vm1935_vm6 = vmpackc.low %vm688_vm4, %vm687_vm5 }
 0x10c   : > { %1936 = vmatprep.subr.msk.bf16.mxu0 %vm1935_vm6, %v2073_v19  ;;  %vm2075_vm6 = vmmov 0  }
 0x10d   : > { %v656_v14 = vpop.permute.xlu1 %655  ;;  %v653_v15 = vpop.permute.xlu0 %652 }
 0x10e   : > { %vm720_vm7 = vcmp.eq.s32.totalorder %v656_v14, %v2365_v12  ;;  %vm719_vm8 = vcmp.eq.s32.totalorder %v653_v15, %v2365_v12 }
 0x10f   : > { %vm1967_vm9 = vmpackc.low %vm720_vm7, %vm719_vm8 }
 0x110   : > { %1968 = vmatprep.subr.msk.bf16.mxu1 %vm1967_vm9, %v2073_v19 }
 0x111   : > { %v512_v16 = vpop.permute.xlu1 %511  ;;  %v509_v17 = vpop.permute.xlu0 %508 }
 0x112   : > { %vm672_vm10 = vcmp.eq.s32.totalorder %v512_v16, %v2365_v12  ;;  %vm671_vm11 = vcmp.eq.s32.totalorder %v509_v17, %v2365_v12 }
 0x113   : > { %vm1937_vm12 = vmpackc.low %vm672_vm10, %vm671_vm11 }
 0x114   : > { %1938 = vmatpush3.bf16.msk.msra.mxu0 %vm1937_vm12, %v2073_v19 }
 0x115   : > { %v608_v20 = vpop.permute.xlu1 %607  ;;  %v605_v21 = vpop.permute.xlu0 %604 }
 0x116   : > { %vm704_vm13 = vcmp.eq.s32.totalorder %v608_v20, %v2365_v12  ;;  %vm703_vm14 = vcmp.eq.s32.totalorder %v605_v21, %v2365_v12  ;;  %v858_v12 = vld [vmem:[%s2591_s1 + $0x48] sm:$0xff] }
 0x117   : > { %vm1969_vm15 = vmpackc.low %vm704_vm13, %vm703_vm14  ;;  %930 = vmatmul.mubr.f32.vlgmr.msra.gmra.mrb[0].mxu0 %v849_v18 }
 0x118   : > { %1970 = vmatpush3.bf16.msk.msra.mxu1 %vm1969_vm15, %v2073_v19  ;;  %934 = vmatprep.mubr.f32.mxu0 %v854_v22  ;;  %v855_v19 = vld [vmem:[%s2591_s1 + $0x30] sm:$0xff] }
 0x119   : > { %v1253_v11 = vpop.permute.xlu1 %1252  ;;  %v1248_v13 = vpop.permute.xlu0 %1247 }
 0x11b   : > { %1015 = vmatmul.mubr.f32.vlgmr.msra.gmra.mrb[0].mxu1 %v851_v23  ;;  %935 = vmatmul.mubr.f32.gmra.mrb[2].mxu0 %v853_v24 }
 0x11c   : > { %1019 = vmatprep.mubr.f32.mxu1 %v856_v25  ;;  %939 = vmatprep.mubr.f32.mxu0 %v858_v12 }
 0x11d   : > { %v1263_v20 = vpop.permute.xlu1 %1262  ;;  %v1258_v23 = vpop.permute.xlu0 %1257 }
 0x11f   : > { %1020 = vmatmul.mubr.f32.gmra.mrb[2].mxu1 %v855_v19  ;;  %940 = vmatmul.mubr.f32.gmra.mrb[4].mxu0 %v857_v26 }
 0x120   : > { %1024 = vmatprep.mubr.f32.mxu1 %v860_v27  ;;  %944 = vmatprep.mubr.f32.mxu0 %v862_v28 }
 0x123   : > { %1025 = vmatmul.mubr.f32.gmra.mrb[4].mxu1 %v859_v29  ;;  %945 = vmatmul.mubr.f32.gmra.mrb[6].mxu0 %v861_v30 }
 0x124   : > { %1029 = vmatprep.mubr.f32.mxu1 %v864_v31  ;;  %1866 = vmatprep.mubr.msk.f32.mxu0 %vm1045_vm0, %v1041_v33 }
 0x127   : > { %1030 = vmatmul.mubr.f32.gmra.mrb[6].mxu1 %v863_v32 }
 0x128   : > { %1890 = vmatprep.mubr.msk.f32.mxu1 %vm1045_vm0, %v1293_v10 }
 0x1ea   : > { %v1775_v34 = vpop.f32.mrb[0].mxu0 }
 0x1eb   : > { %v1776_v35 = vpop.f32.mrb[1].mxu0 }
 0x1ec   : > { %v1777_v36 = vadd.f32 %v1776_v35, %v1775_v34 }
 0x1ee   : > { %v1819_v37 = vpop.f32.mrb[0].mxu1  ;;  %v1778_v38 = vpop.f32.mrb[2].mxu0 }
 0x1ef   : > { %v1820_v39 = vpop.f32.mrb[1].mxu1  ;;  %v1779_v40 = vpop.f32.mrb[3].mxu0 }
 0x1f0   : > { %v1821_v41 = vadd.f32 %v1820_v39, %v1819_v37  ;;  %v1780_v42 = vadd.f32 %v1779_v40, %v1778_v38 }
 0x1f2   : > { %v1017_v43 = vadd.f32 %v1821_v41, %v1777_v36  ;;  %v1822_v44 = vpop.f32.mrb[2].mxu1  ;;  %v1781_v45 = vpop.f32.mrb[4].mxu0 }
 0x1f3   : > { %v1823_v46 = vpop.f32.mrb[3].mxu1  ;;  %v1782_v47 = vpop.f32.mrb[5].mxu0 }
 0x1f4   : > { %v1824_v48 = vadd.f32 %v1823_v46, %v1822_v44  ;;  %v1783_v49 = vadd.f32 %v1782_v47, %v1781_v45  ;;  %v1294_v45 = vld [vmem:[%s2596_s6 + $0x8] sm:$0xff]  ;;  %v1295_v46 = vld [vmem:[%s2596_s6 + $0x10] sm:$0xff]  ;;  %v1296_v47 = vld [vmem:[%s2596_s6 + $0x18] sm:$0xff] }
 0x1f6   : > { %v1022_v50 = vadd.f32 %v1824_v48, %v1780_v42  ;;  %v1825_v51 = vpop.f32.mrb[4].mxu1  ;;  %v1784_v52 = vpop.f32.mrb[6].mxu0  ;;  %v2074_v48 = vmov 0.0|0.0  }
 0x1f7   : > { %v1826_v53 = vpop.f32.mrb[5].mxu1  ;;  %v1785_v54 = vpop.f32.mrb[7].mxu0 }
 0x1f8   : > { %v1827_v55 = vadd.f32 %v1826_v53, %v1825_v51  ;;  %v1786_v56 = vadd.f32 %v1785_v54, %v1784_v52  ;;  %v1971_v57 = vpack.c.bf16 %v1022_v50, %v1017_v43  ;;  %v1309_v50 = vpop.permute.xlu1 %1308  ;;  %v1304_v51 = vpop.permute.xlu0 %1303 }
 0x1fa   : > { %v1027_v58 = vadd.f32 %v1827_v55, %v1783_v49  ;;  %v1828_v59 = vpop.f32.mrb[6].mxu1  ;;  %1972 = vmatprep.subr.bf16.mxu0 %v1971_v57  ;;  %v2076_v49 = vmov 0.0  }
 0x1fb   : > { %v1829_v60 = vpop.f32.mrb[7].mxu1  ;;  %1974 = vmatpush3.bf16.msra.mxu0 %v1971_v57 }
 0x1fc   : > { %v1830_v61 = vadd.f32 %v1829_v60, %v1828_v59  ;;  %v1319_v57 = vpop.permute.xlu1 %1318  ;;  %v1314_v60 = vpop.permute.xlu0 %1313 }
 0x1fe   : > { %v1032_v0 = vadd.f32 %v1830_v61, %v1786_v56 }
 0x200   : > { %v1975_v1 = vpack.c.bf16 %v1032_v0, %v1027_v58 }
 0x202   : > { %1976 = vmatprep.subr.bf16.mxu0 %v1975_v1 }
 0x203   : > { %1978 = vmatpush3.bf16.msra.mxu0 %v1975_v1 }
 0x204   : > { %1980 = vmatprep.subr.bf16.mxu0 %v1979_v2 }
 0x206   : > { %1867 = vmatmul.mubr.msk.f32.vlgmr.msra.gmra.mrb[8].mxu0 %vm1045_vm0, %v1042_v3 }
 0x207   : > { %1869 = vmatprep.mubr.msk.f32.mxu0 %vm1045_vm0, %v1043_v4  ;;  %1982 = vmatpush3.bf16.msra.mxu0 %v1979_v2 }
 0x20a   : > { %1870 = vmatmul.mubr.msk.f32.gmra.mrb[10].mxu0 %vm1045_vm0, %v1044_v5 }
 0x20b   : > { %1876 = vmatprep.mubr.msk.f32.mxu0 %vm1143_vm1, %v1035_v6 }
 0x20e   : > { %1877 = vmatmul.mubr.msk.f32.vlgmr.msra.gmra.mrb[8].mxu0 %vm1143_vm1, %v1036_v7 }
 0x20f   : > { %1879 = vmatprep.mubr.msk.f32.mxu0 %vm1143_vm1, %v1037_v8 }
 0x212   : > { %1880 = vmatmul.mubr.msk.f32.gmra.mrb[10].mxu0 %vm1143_vm1, %v1038_v9 }
 0x2e1   : > { %v1878_v14 = vpop.f32.mrb[8].mxu0 }
 0x2e2   : > { %v1266_v15 = vadd.f32 %v1878_v14, %v1253_v11  ;;  %v1222_v16 = vpop.f32.mrb[9].mxu0 }
 0x2e3   : > { %v1265_v17 = vadd.f32 %v1248_v13, %v1222_v16 }
 0x2e4   : > { %v1274_v18 = vmin.f32 %v1266_v15, 0.0  ;;  %vm1270_vm2 = vcmp.gt.f32.partialorder %v1266_v15, 0.0 }
 0x2e5   : > { %v1273_v21 = vmin.f32 %v1265_v17, 0.0  ;;  %v1881_v22 = vpop.f32.mrb[10].mxu0  ;;  %vm1269_vm3 = vcmp.gt.f32.partialorder %v1265_v17, 0.0 }
 0x2e6   : > { %v1279_v24 = vmul.f32 1.442695, %v1274_v18  ;;  %v1268_v25 = vadd.f32 %v1881_v22, %v1263_v20  ;;  %v1232_v12 = vpop.f32.mrb[11].mxu0  ;;  %v1442_v22 = vld [vmem:[%s2598_s8] sm:$0xff] }
 0x2e7   : > { %v1277_v19 = vmul.f32 1.442695, %v1273_v21  ;;  %v1267_v26 = vadd.f32 %v1258_v23, %v1232_v12  ;;  %v1447_v23 = vpop.permute.xlu0 %1446 }
 0x2e8   : > { %2032 = vpow2.f32 %v1279_v24  ;;  %v1276_v27 = vmin.f32 %v1268_v25, 0.0  ;;  %vm1272_vm4 = vcmp.gt.f32.partialorder %v1268_v25, 0.0 }
 0x2e9   : > { %2034 = vpow2.f32 %v1277_v19  ;;  %v1275_v28 = vmin.f32 %v1267_v26, 0.0  ;;  %vm1271_vm5 = vcmp.gt.f32.partialorder %v1267_v26, 0.0 }
 0x2ea   : > { %v1283_v29 = vmul.f32 1.442695, %v1276_v27 }
 0x2eb   : > { %v1281_v30 = vmul.f32 1.442695, %v1275_v28 }
 0x2ec   : > { %2036 = vpow2.f32 %v1283_v29 }
 0x2ed   : > { %2038 = vpow2.f32 %v1281_v30 }
 0x2f2   : > { %v2033_v31 = vpop.eup %2032 }
 0x2f3   : > { %v2035_v32 = vpop.eup %2034  ;;  %v1729_v33 = vadd.f32 -1.0, %v2033_v31 }
 0x2f4   : > { %v1728_v34 = vadd.f32 -1.0, %v2035_v32 }
 0x2f5   : > { %v1290_v35 = vsel %vm1270_vm2, %v1266_v15, %v1729_v33 }
 0x2f6   : > { %v2037_v36 = vpop.eup %2036  ;;  %v1289_v37 = vsel %vm1269_vm3, %v1265_v17, %v1728_v34 }
 0x2f7   : > { %v2039_v38 = vpop.eup %2038  ;;  %v1731_v39 = vadd.f32 -1.0, %v2037_v36  ;;  %v1983_v40 = vpack.c.bf16 %v1290_v35, %v1289_v37 }
 0x2f8   : > { %v1730_v41 = vadd.f32 -1.0, %v2039_v38 }
 0x2f9   : > { %1984 = vmatprep.subr.bf16.mxu1 %v1983_v40  ;;  %v1292_v42 = vsel %vm1272_vm4, %v1268_v25, %v1731_v39 }
 0x2fa   : > { %1986 = vmatpush3.bf16.msra.mxu1 %v1983_v40  ;;  %v1291_v43 = vsel %vm1271_vm5, %v1267_v26, %v1730_v41 }
 0x2fb   : > { %v1987_v44 = vpack.c.bf16 %v1292_v42, %v1291_v43 }
 0x2fd   : > { %1988 = vmatprep.subr.bf16.mxu1 %v1987_v44 }
 0x2fe   : > { %1990 = vmatpush3.bf16.msra.mxu1 %v1987_v44 }
 0x2ff   : > { %1991 = vmatprep.subr.bf16.mxu1 %v2074_v48 }
 0x301   : > { %1891 = vmatmul.mubr.msk.f32.vlgmr.msra.gmra.mrb[8].mxu1 %vm1045_vm0, %v1294_v45 }
 0x302   : > { %1893 = vmatprep.mubr.msk.f32.mxu1 %vm1045_vm0, %v1295_v46 }
 0x305   : > { %1894 = vmatmul.mubr.msk.f32.gmra.mrb[10].mxu1 %vm1045_vm0, %v1296_v47 }
 0x306   : > { %1904 = vmatprep.mubr.msk.f32.mxu1 %vm2075_vm6, %v2076_v49 }
 0x3d4   : > { %v1892_v52 = vpop.f32.mrb[8].mxu1 }
 0x3d5   : > { %v1405_v53 = vadd.f32 %v1892_v52, %v1309_v50  ;;  %v1399_v54 = vpop.f32.mrb[9].mxu1 }
 0x3d6   : > { %v1400_v55 = vadd.f32 %v1399_v54, %v1304_v51 }
 0x3d7   : > { %v1423_v56 = vmin.f32 %v1405_v53, 0.0  ;;  %vm1419_vm7 = vcmp.gt.f32.partialorder %v1405_v53, 0.0 }
 0x3d8   : > { %v1422_v58 = vmin.f32 %v1400_v55, 0.0  ;;  %v1895_v59 = vpop.f32.mrb[10].mxu1  ;;  %vm1418_vm8 = vcmp.gt.f32.partialorder %v1400_v55, 0.0 }
 0x3d9   : > { %v1428_v61 = vmul.f32 1.442695, %v1423_v56  ;;  %v1415_v62 = vadd.f32 %v1895_v59, %v1319_v57  ;;  %v1409_v63 = vpop.f32.mrb[11].mxu1 }
 0x3da   : > { %v1426_v0 = vmul.f32 1.442695, %v1422_v58  ;;  %v1410_v1 = vadd.f32 %v1409_v63, %v1314_v60 }
 0x3db   : > { %2040 = vpow2.f32 %v1428_v61  ;;  %v1425_v2 = vmin.f32 %v1415_v62, 0.0  ;;  %vm1421_vm9 = vcmp.gt.f32.partialorder %v1415_v62, 0.0 }
 0x3dc   : > { %2042 = vpow2.f32 %v1426_v0  ;;  %v1424_v3 = vmin.f32 %v1410_v1, 0.0  ;;  %vm1420_vm10 = vcmp.gt.f32.partialorder %v1410_v1, 0.0 }
 0x3dd   : > { %v1432_v4 = vmul.f32 1.442695, %v1425_v2 }
 0x3de   : > { %v1430_v5 = vmul.f32 1.442695, %v1424_v3 }
 0x3df   : > { %2044 = vpow2.f32 %v1432_v4 }
 0x3e0   : > { %2046 = vpow2.f32 %v1430_v5 }
 0x3e5   : > { %v2041_v6 = vpop.eup %2040 }
 0x3e6   : > { %v2043_v7 = vpop.eup %2042  ;;  %v1737_v8 = vadd.f32 -1.0, %v2041_v6 }
 0x3e7   : > { %v1736_v9 = vadd.f32 -1.0, %v2043_v7 }
 0x3e8   : > { %v1439_v10 = vsel %vm1419_vm7, %v1405_v53, %v1737_v8 }
 0x3e9   : > { %v2045_v11 = vpop.eup %2044  ;;  %v1438_v13 = vsel %vm1418_vm8, %v1400_v55, %v1736_v9 }
 0x3ea   : > { %v2047_v14 = vpop.eup %2046  ;;  %v1992_v15 = vpack.c.bf16 %v1439_v10, %v1438_v13  ;;  %v1739_v16 = vadd.f32 -1.0, %v2045_v11 }
 0x3eb   : > { %v1738_v17 = vadd.f32 -1.0, %v2047_v14 }
 0x3ec   : > { %v1441_v18 = vsel %vm1421_vm9, %v1415_v62, %v1739_v16  ;;  %1993 = vmatpush3.bf16.msra.mxu1 %v1992_v15 }
 0x3ed   : > { %v1440_v20 = vsel %vm1420_vm10, %v1410_v1, %v1738_v17  ;;  %1994 = vmatprep.subr.bf16.mxu1 %v2074_v48 }
 0x3ee   : > { %v1995_v21 = vpack.c.bf16 %v1441_v18, %v1440_v20 }
 0x3f0   : > { %1996 = vmatpush3.bf16.msra.mxu1 %v1995_v21 }
 0x3f3   : > { %1905 = vmatmul.mubr.msk.f32.vlgmr.msra.gmra.mrb[12].mxu1 %vm1045_vm0, %v1442_v22 }
 0x4c6   : > { %v1518_v24 = vpop.f32.mrb[12].mxu1 }
 0x4c7   : > { %v1519_v25 = vadd.f32 %v1518_v24, %v1447_v23  ;;  %v1906_v12 = vpop.f32.mrb[13].mxu1 }
 0x4c9   : > { %1522 = vst [vmem:[%s395_s27] sm:$0xff] %v1519_v25 }
 0x4ca PF: > { %p17_p9 = scmp.ge.s32.totalorder %s2147_s17, 4   ;;  %s2601_s13 = smov %s2066_s14 }
 0x4cb   : > { %s2602_s14 = smov %s2154_s20  ;;  %s2603_s15 = smov %s2147_s17 }
 0x4cc   :  { %19 = sbr.rel (!%p17_p9) target bundleno = 2 (0x2), region = 133 }

</bundles_post_ra>
